<compile_context>
chip_gen: v7x
topology: tpu7x:2x2x1
jax: 0.10.0
libtpu: 0.0.40
codegen_flags: <defaults>
</compile_context>

<pallas_src>
import jax
import jax.numpy as jnp
from jax import lax
from jax.experimental import pallas as pl
from jax.experimental.pallas import tpu as pltpu


# --------------------------------------------------------------------------- #
# Kernel
# --------------------------------------------------------------------------- #
def _last_conv_kernel(x_ref, w1a_ref, w1b_ref, b1_ref,
                      w2a_ref, w2b_ref, b2_ref, o_ref):
    # x_ref : (Nb, H, W*Cin)       input, W and Cin folded on the lane axis
    # w1a/b : (W*Cin, Wo1*Cin)     conv1 block-Toeplitz weights for di = 0 / 1
    # b1    : (1, 1, Wo1*Cin)      conv1 bias tiled along W (f32)
    # w2a/b : (Wo1*Cin, Wo*Cout)   conv2 block-Toeplitz weights for di = 0 / 1
    # b2    : (1, 1, Wo*Cout)      conv2 bias tiled along W (f32)
    # o_ref : (Nb, Ho, Wo*Cout)    Ho = H-2, last dim lane-folded, stored exact
    Nb, H, WC = x_ref.shape
    L1 = w1a_ref.shape[1]
    L2 = w2a_ref.shape[1]
    Ho = o_ref.shape[1]
    Ho1 = H - 1

    # ---- conv1 ------------------------------------------------------------ #
    # dj taps are inside the Toeplitz weights; di taps = one-row shift-add.
    x2 = x_ref[...].reshape(Nb * H, WC)            # free when H % 8 == 0
    in_dtype = x2.dtype
    a = jnp.dot(x2, w1a_ref[...],
                preferred_element_type=jnp.float32).reshape(Nb, H, L1)
    b = jnp.dot(x2, w1b_ref[...],
                preferred_element_type=jnp.float32).reshape(Nb, H, L1)
    h1 = a[:, :Ho1, :] + b[:, 1:, :] + b1_ref[...]          # (Nb, Ho1, L1) f32
    h1 = jnp.where(h1 >= 0, h1, 0.01 * h1)                  # LeakyReLU(0.01)
    h1 = h1.astype(in_dtype)

    # ---- conv2 ------------------------------------------------------------ #
    # Pad one throw-away zero row per image so the 2-D reshape keeps M a clean
    # multiple of H (no sublane relayout).  The padded row never reaches o_ref.
    h1p = jnp.concatenate([h1, jnp.zeros((Nb, 1, L1), in_dtype)], axis=1)
    h1p2 = h1p.reshape(Nb * H, L1)
    c = jnp.dot(h1p2, w2a_ref[...],
                preferred_element_type=jnp.float32).reshape(Nb, H, L2)
    d = jnp.dot(h1p2, w2b_ref[...],
                preferred_element_type=jnp.float32).reshape(Nb, H, L2)
    h2 = c[:, :Ho, :] + d[:, 1:Ho + 1, :] + b2_ref[...]     # (Nb, Ho, L2) f32
    o_ref[...] = h2.astype(o_ref.dtype)


# --------------------------------------------------------------------------- #
# Hoisted parameter prep
# --------------------------------------------------------------------------- #
def _toeplitz_weights(w_di, w_in, wo):
    """w_di: (2, Cin, Co) = (dj, c, co) taps for a fixed di.

    Returns the (w_in*Cin, wo*Co) block-Toeplitz matrix M with
    M[(j+dj)*Cin + c, j*Co + co] = w_di[dj, c, co], so a row of the image
    (flattened as W*Cin lanes) matmul'd by M applies both dj taps of the
    width-2 valid conv along W in a single MXU pass.
    """
    _, cin, co = w_di.shape
    eye = jnp.eye(wo, dtype=w_di.dtype)
    out = jnp.zeros((w_in * cin, wo * co), dtype=w_di.dtype)
    for dj in range(2):
        blk = jnp.kron(eye, w_di[dj])                       # (wo*cin, wo*co)
        out = out + jnp.pad(blk, ((dj * cin, (w_in - wo - dj) * cin), (0, 0)))
    return out


# --------------------------------------------------------------------------- #
# VMEM budgeting / batch blocking
# --------------------------------------------------------------------------- #
def _vmem_budget():
    """(working-set budget, vmem_limit_bytes), generation aware."""
    cap = 64 * 1024 * 1024          # conservative fallback = v7x physical VMEM
    try:
        cap = int(pltpu.get_tpu_info().vmem_capacity_bytes)
    except Exception:
        pass
    budget = (cap * 3) // 8         # ~24 MiB on v7x, ~48 MiB on v5e/v6e
    limit = min((cap * 3) // 4, 100 * 1024 * 1024)
    return budget, limit


def _vmem_per_block(nb, h, w, cin, cout, itemsize):
    """Conservative per-grid-step VMEM estimate: double-buffered in/out blocks,
    resident params, and the in-kernel f32 accumulators/temporaries."""
    wo1, wo, ho = w - 1, w - 2, h - 2
    wc, l1, l2 = w * cin, wo1 * cin, wo * cout
    io = 2 * nb * (h * wc + ho * l2) * itemsize              # pipelined blocks
    params = 2 * (2 * wc * l1 + 2 * l1 * l2) * itemsize + 2 * (l1 + l2) * 4
    tmp = nb * (h * wc * itemsize                            # x2
                + 2 * h * l1 * 4                             # conv1 f32 acc
                + h * l1 * (4 + itemsize)                    # h1 (+ padded copy)
                + 2 * h * l2 * 4                             # conv2 f32 acc
                + ho * l2 * 4)                               # h2
    return io + params + tmp


def _pick_batch_block(n, h, w, cin, cout, itemsize, budget):
    """Largest divisor of N whose working set fits the VMEM budget.  When N is
    splittable, keep at least 2 grid steps so (a) v7x's second TensorCore gets
    work under dimension_semantics=("parallel",) and (b) the auto-pipeline has
    DMA to overlap with compute."""
    max_block = n if n == 1 else n // 2
    best = 1
    for d in range(1, n + 1):
        if n % d or d > max_block:
            continue
        if _vmem_per_block(d, h, w, cin, cout, itemsize) <= budget:
            best = d
    return best


# --------------------------------------------------------------------------- #
# Wrappers
# --------------------------------------------------------------------------- #
def last_conv_forward_nhwc(x_nhwc, w1, b1, w2, b2, *, batch_block=None):
    """Fused last_conv on NHWC data.
    x: (N,H,W,Cin), w1: (2,2,Cin,Cin), b1: (Cin,), w2: (2,2,Cin,Cout),
    b2: (Cout,).  Returns (N, H-2, W-2, Cout)."""
    N, H, W, Cin = x_nhwc.shape
    Cout = w2.shape[-1]
    assert H >= 3 and W >= 3, "two valid 2x2 convs need H, W >= 3"
    Ho1, Wo1 = H - 1, W - 1
    Ho, Wo = H - 2, W - 2
    WC, L1, L2 = W * Cin, Wo1 * Cin, Wo * Cout
    dt = x_nhwc.dtype

    # Hoisted parameter prep (once, in the wrapper).  For v5e, casting x and
    # the Toeplitz weights to bf16 here roughly doubles MXU/DMA throughput
    # when the accuracy budget allows; kept in the input dtype by default.
    w1a = _toeplitz_weights(w1[0], W, Wo1).astype(dt)
    w1b = _toeplitz_weights(w1[1], W, Wo1).astype(dt)
    w2a = _toeplitz_weights(w2[0], Wo1, Wo).astype(dt)
    w2b = _toeplitz_weights(w2[1], Wo1, Wo).astype(dt)
    b1t = jnp.tile(b1.astype(jnp.float32), Wo1).reshape(1, 1, L1)
    b2t = jnp.tile(b2.astype(jnp.float32), Wo).reshape(1, 1, L2)

    x_folded = x_nhwc.reshape(N, H, WC)          # free: NHWC is contiguous

    budget, vmem_limit = _vmem_budget()
    if batch_block is None:
        batch_block = _pick_batch_block(N, H, W, Cin, Cout, dt.itemsize, budget)
    if N % batch_block != 0:
        raise ValueError(f"batch_block={batch_block} must divide N={N}")
    grid = (N // batch_block,)

    out = pl.pallas_call(
        _last_conv_kernel,
        out_shape=jax.ShapeDtypeStruct((N, Ho, L2), dt),
        grid_spec=pltpu.PrefetchScalarGridSpec(
            num_scalar_prefetch=0,
            grid=grid,
            in_specs=[
                pl.BlockSpec((batch_block, H, WC), lambda n: (n, 0, 0)),
                pl.BlockSpec((WC, L1), lambda n: (0, 0)),
                pl.BlockSpec((WC, L1), lambda n: (0, 0)),
                pl.BlockSpec((1, 1, L1), lambda n: (0, 0, 0)),
                pl.BlockSpec((L1, L2), lambda n: (0, 0)),
                pl.BlockSpec((L1, L2), lambda n: (0, 0)),
                pl.BlockSpec((1, 1, L2), lambda n: (0, 0, 0)),
            ],
            out_specs=pl.BlockSpec((batch_block, Ho, L2),
                                   lambda n: (n, 0, 0)),
        ),
        compiler_params=pltpu.CompilerParams(
            dimension_semantics=("parallel",),
            vmem_limit_bytes=int(vmem_limit)),
    )(x_folded, w1a, w1b, b1t, w2a, w2b, b2t)

    return out.reshape(N, Ho, Wo, Cout)          # free: lane fold undone


def last_conv_forward(x_nchw, w1, b1, w2, b2, *, batch_block=None):
    """PyTorch-layout entry point: x (N,Cin,H,W) -> (N,Cout,H-2,W-2).
    NCHW<->NHWC transposes live only here; NHWC callers should use
    last_conv_forward_nhwc directly."""
    x_nhwc = jnp.transpose(x_nchw, (0, 2, 3, 1))
    y_nhwc = last_conv_forward_nhwc(x_nhwc, w1, b1, w2, b2,
                                    batch_block=batch_block)
    return jnp.transpose(y_nhwc, (0, 3, 1, 2))


# --------------------------------------------------------------------------- #
# Pure-JAX reference + self-test
# --------------------------------------------------------------------------- #
def _reference_forward(x_nchw, w1, b1, w2, b2):
    """Reference with lax.conv_general_dilated (NCHW, OIHW)."""
    w1_oihw = jnp.transpose(w1, (3, 2, 0, 1))
    w2_oihw = jnp.transpose(w2, (3, 2, 0, 1))
    dn = ("NCHW", "OIHW", "NCHW")
    h = lax.conv_general_dilated(x_nchw, w1_oihw, (1, 1), "VALID",
                                 dimension_numbers=dn)
    h = h + b1.reshape(1, -1, 1, 1)
    h = jnp.where(h >= 0, h, 0.01 * h)
    y = lax.conv_general_dilated(h, w2_oihw, (1, 1), "VALID",
                                 dimension_numbers=dn)
    return y + b2.reshape(1, -1, 1, 1)


if __name__ == "__main__":
    N, in_ch, out_ch, H, W = 2, 4, 8, 16, 16

    key = jax.random.PRNGKey(0)
    kx, kw1, kb1, kw2, kb2 = jax.random.split(key, 5)

    x = jax.random.normal(kx, (N, in_ch, H, W), dtype=jnp.float32)
    # synthetic params (PyTorch shapes: conv1 (in,in,2,2), conv2 (out,in,2,2)),
    # stored here as (kh, kw, Cin, Cout)
    w1 = 0.1 * jax.random.normal(kw1, (2, 2, in_ch, in_ch), dtype=jnp.float32)
    b1 = 0.1 * jax.random.normal(kb1, (in_ch,), dtype=jnp.float32)
    w2 = 0.1 * jax.random.normal(kw2, (2, 2, in_ch, out_ch), dtype=jnp.float32)
    b2 = 0.1 * jax.random.normal(kb2, (out_ch,), dtype=jnp.float32)

    fwd = jax.jit(last_conv_forward)
    y = fwd(x, w1, b1, w2, b2)
    jax.block_until_ready(y)

    y_ref = _reference_forward(x, w1, b1, w2, b2)
    assert y.shape == (N, out_ch, H - 2, W - 2), y.shape
    assert jnp.allclose(y, y_ref, atol=1e-4, rtol=1e-4), float(
        jnp.max(jnp.abs(y - y_ref)))

    print("KERNEL_OK")
</pallas_src>

<mosaic_0001>
module attributes {stable_mosaic.version = 11 : i64} {
  func.func @_last_conv_kernel(%arg0: i32, %arg1: memref<1x16x64xf32, #tpu.memory_space<vmem>>, %arg2: memref<64x60xf32, #tpu.memory_space<vmem>>, %arg3: memref<64x60xf32, #tpu.memory_space<vmem>>, %arg4: memref<1x1x60xf32, #tpu.memory_space<vmem>>, %arg5: memref<60x112xf32, #tpu.memory_space<vmem>>, %arg6: memref<60x112xf32, #tpu.memory_space<vmem>>, %arg7: memref<1x1x112xf32, #tpu.memory_space<vmem>>, %arg8: memref<1x14x112xf32, #tpu.memory_space<vmem>>) attributes {dimension_semantics = [#tpu.dimension_semantics<parallel>], iteration_bounds = array<i64: 2>, scalar_prefetch = 0 : i64, scratch_operands = 0 : i64, tpu.core_type = #tpu.core_type<tc>, window_params = [{transform_indices = @transform_0, window_bounds = array<i64: 1, 16, 64>}, {pipeline_mode = #tpu.pipeline_mode<synchronous>, transform_indices = @transform_1, window_bounds = array<i64: 64, 60>}, {pipeline_mode = #tpu.pipeline_mode<synchronous>, transform_indices = @transform_2, window_bounds = array<i64: 64, 60>}, {pipeline_mode = #tpu.pipeline_mode<synchronous>, transform_indices = @transform_3, window_bounds = array<i64: 1, 1, 60>}, {pipeline_mode = #tpu.pipeline_mode<synchronous>, transform_indices = @transform_4, window_bounds = array<i64: 60, 112>}, {pipeline_mode = #tpu.pipeline_mode<synchronous>, transform_indices = @transform_5, window_bounds = array<i64: 60, 112>}, {pipeline_mode = #tpu.pipeline_mode<synchronous>, transform_indices = @transform_6, window_bounds = array<i64: 1, 1, 112>}, {transform_indices = @transform_7, window_bounds = array<i64: 1, 14, 112>}]} {
    %c0 = arith.constant 0 : index
    %c0_0 = arith.constant 0 : index
    %c0_1 = arith.constant 0 : index
    %0 = vector.load %arg1[%c0, %c0_0, %c0_1] : memref<1x16x64xf32, #tpu.memory_space<vmem>>, vector<1x16x64xf32>
    %1 = vector.shape_cast %0 : vector<1x16x64xf32> to vector<16x64xf32>
    %c0_2 = arith.constant 0 : index
    %c0_3 = arith.constant 0 : index
    %2 = vector.load %arg2[%c0_2, %c0_3] : memref<64x60xf32, #tpu.memory_space<vmem>>, vector<64x60xf32>
    %cst = arith.constant dense<0.000000e+00> : vector<16x60xf32>
    %3 = tpu.matmul %1, %2, %cst {dimension_numbers = #tpu.dot_dimension_numbers<[1], [0], [0], [1], [0, 0, 1, 1], [], []>} : vector<16x64xf32>, vector<64x60xf32>, vector<16x60xf32> -> vector<16x60xf32>
    %4 = vector.shape_cast %3 : vector<16x60xf32> to vector<1x16x60xf32>
    %c0_4 = arith.constant 0 : index
    %c0_5 = arith.constant 0 : index
    %5 = vector.load %arg3[%c0_4, %c0_5] : memref<64x60xf32, #tpu.memory_space<vmem>>, vector<64x60xf32>
    %cst_6 = arith.constant dense<0.000000e+00> : vector<16x60xf32>
    %6 = tpu.matmul %1, %5, %cst_6 {dimension_numbers = #tpu.dot_dimension_numbers<[1], [0], [0], [1], [0, 0, 1, 1], [], []>} : vector<16x64xf32>, vector<64x60xf32>, vector<16x60xf32> -> vector<16x60xf32>
    %7 = vector.shape_cast %6 : vector<16x60xf32> to vector<1x16x60xf32>
    %8 = vector.extract_strided_slice %4 {offsets = [0, 0, 0], sizes = [1, 15, 60], strides = [1, 1, 1]} : vector<1x16x60xf32> to vector<1x15x60xf32>
    %9 = vector.extract_strided_slice %7 {offsets = [0, 1, 0], sizes = [1, 15, 60], strides = [1, 1, 1]} : vector<1x16x60xf32> to vector<1x15x60xf32>
    %10 = arith.addf %8, %9 : vector<1x15x60xf32>
    %c0_7 = arith.constant 0 : index
    %c0_8 = arith.constant 0 : index
    %c0_9 = arith.constant 0 : index
    %11 = vector.load %arg4[%c0_7, %c0_8, %c0_9] : memref<1x1x60xf32, #tpu.memory_space<vmem>>, vector<1x1x60xf32>
    %12 = vector.broadcast %11 : vector<1x1x60xf32> to vector<1x15x60xf32>
    %13 = arith.addf %10, %12 : vector<1x15x60xf32>
    %cst_10 = arith.constant 0.000000e+00 : f32
    %14 = vector.broadcast %cst_10 : f32 to vector<1x15x60xf32>
    %15 = arith.cmpf oge, %13, %14 : vector<1x15x60xf32>
    %cst_11 = arith.constant 0.00999999977 : f32
    %16 = vector.broadcast %cst_11 : f32 to vector<1x15x60xf32>
    %17 = arith.mulf %16, %13 : vector<1x15x60xf32>
    %18 = arith.select %15, %13, %17 : vector<1x15x60xi1>, vector<1x15x60xf32>
    %cst_12 = arith.constant 0.000000e+00 : f32
    %19 = vector.broadcast %cst_12 : f32 to vector<1x1x60xf32>
    %20 = tpu.concatenate %18, %19 in 1 : vector<1x15x60xf32>, vector<1x1x60xf32> -> vector<1x16x60xf32>
    %21 = vector.shape_cast %20 : vector<1x16x60xf32> to vector<16x60xf32>
    %c0_13 = arith.constant 0 : index
    %c0_14 = arith.constant 0 : index
    %22 = vector.load %arg5[%c0_13, %c0_14] : memref<60x112xf32, #tpu.memory_space<vmem>>, vector<60x112xf32>
    %cst_15 = arith.constant dense<0.000000e+00> : vector<16x112xf32>
    %23 = tpu.matmul %21, %22, %cst_15 {dimension_numbers = #tpu.dot_dimension_numbers<[1], [0], [0], [1], [0, 0, 1, 1], [], []>} : vector<16x60xf32>, vector<60x112xf32>, vector<16x112xf32> -> vector<16x112xf32>
    %24 = vector.shape_cast %23 : vector<16x112xf32> to vector<1x16x112xf32>
    %c0_16 = arith.constant 0 : index
    %c0_17 = arith.constant 0 : index
    %25 = vector.load %arg6[%c0_16, %c0_17] : memref<60x112xf32, #tpu.memory_space<vmem>>, vector<60x112xf32>
    %cst_18 = arith.constant dense<0.000000e+00> : vector<16x112xf32>
    %26 = tpu.matmul %21, %25, %cst_18 {dimension_numbers = #tpu.dot_dimension_numbers<[1], [0], [0], [1], [0, 0, 1, 1], [], []>} : vector<16x60xf32>, vector<60x112xf32>, vector<16x112xf32> -> vector<16x112xf32>
    %27 = vector.shape_cast %26 : vector<16x112xf32> to vector<1x16x112xf32>
    %28 = vector.extract_strided_slice %24 {offsets = [0, 0, 0], sizes = [1, 14, 112], strides = [1, 1, 1]} : vector<1x16x112xf32> to vector<1x14x112xf32>
    %29 = vector.extract_strided_slice %27 {offsets = [0, 1, 0], sizes = [1, 14, 112], strides = [1, 1, 1]} : vector<1x16x112xf32> to vector<1x14x112xf32>
    %30 = arith.addf %28, %29 : vector<1x14x112xf32>
    %c0_19 = arith.constant 0 : index
    %c0_20 = arith.constant 0 : index
    %c0_21 = arith.constant 0 : index
    %31 = vector.load %arg7[%c0_19, %c0_20, %c0_21] : memref<1x1x112xf32, #tpu.memory_space<vmem>>, vector<1x1x112xf32>
    %32 = vector.broadcast %31 : vector<1x1x112xf32> to vector<1x14x112xf32>
    %33 = arith.addf %30, %32 : vector<1x14x112xf32>
    %c0_22 = arith.constant 0 : index
    %c0_23 = arith.constant 0 : index
    %c0_24 = arith.constant 0 : index
    %34 = vector.load %arg8[%c0_22, %c0_23, %c0_24] : memref<1x14x112xf32, #tpu.memory_space<vmem>>, vector<1x14x112xf32>
    tpu.vector_store %arg8[%c0_22, %c0_23, %c0_24], %33 {strides = array<i32>} : memref<1x14x112xf32, #tpu.memory_space<vmem>>, vector<1x14x112xf32>,
    return
  }
  func.func @transform_0(%arg0: i32) -> (i32, i32, i32) {
    %c0_i32 = arith.constant 0 : i32
    %c0_i32_0 = arith.constant 0 : i32
    %c0_i32_1 = arith.constant 0 : i32
    return %arg0, %c0_i32, %c0_i32_0 : i32, i32, i32
  }
  func.func @transform_1(%arg0: i32) -> (i32, i32) {
    %c0_i32 = arith.constant 0 : i32
    %c0_i32_0 = arith.constant 0 : i32
    %c0_i32_1 = arith.constant 0 : i32
    return %c0_i32, %c0_i32_0 : i32, i32
  }
  func.func @transform_2(%arg0: i32) -> (i32, i32) {
    %c0_i32 = arith.constant 0 : i32
    %c0_i32_0 = arith.constant 0 : i32
    %c0_i32_1 = arith.constant 0 : i32
    return %c0_i32, %c0_i32_0 : i32, i32
  }
  func.func @transform_3(%arg0: i32) -> (i32, i32, i32) {
    %c0_i32 = arith.constant 0 : i32
    %c0_i32_0 = arith.constant 0 : i32
    %c0_i32_1 = arith.constant 0 : i32
    %c0_i32_2 = arith.constant 0 : i32
    return %c0_i32, %c0_i32_0, %c0_i32_1 : i32, i32, i32
  }
  func.func @transform_4(%arg0: i32) -> (i32, i32) {
    %c0_i32 = arith.constant 0 : i32
    %c0_i32_0 = arith.constant 0 : i32
    %c0_i32_1 = arith.constant 0 : i32
    return %c0_i32, %c0_i32_0 : i32, i32
  }
  func.func @transform_5(%arg0: i32) -> (i32, i32) {
    %c0_i32 = arith.constant 0 : i32
    %c0_i32_0 = arith.constant 0 : i32
    %c0_i32_1 = arith.constant 0 : i32
    return %c0_i32, %c0_i32_0 : i32, i32
  }
  func.func @transform_6(%arg0: i32) -> (i32, i32, i32) {
    %c0_i32 = arith.constant 0 : i32
    %c0_i32_0 = arith.constant 0 : i32
    %c0_i32_1 = arith.constant 0 : i32
    %c0_i32_2 = arith.constant 0 : i32
    return %c0_i32, %c0_i32_0, %c0_i32_1 : i32, i32, i32
  }
  func.func @transform_7(%arg0: i32) -> (i32, i32, i32) {
    %c0_i32 = arith.constant 0 : i32
    %c0_i32_0 = arith.constant 0 : i32
    %c0_i32_1 = arith.constant 0 : i32
    return %arg0, %c0_i32, %c0_i32_0 : i32, i32, i32
  }
}

</mosaic_0001>

<bundles_post_ra>
// kernel: tile.13
= control target key start
LH: loop header
LB: loop body
LE: loop exit
PB: predicated region body
PF: predicated region fallthrough
CT: control target
= control target key end

     0   :  { %s28_s0 = inlined_call_operand.vmem [shape: f32[4], index: 0, kind: input, shape index: {}]   ;;  %s29_s1 = inlined_call_operand.vmem [shape: f32[15,4], index: 1, kind: output, shape index: {}]  }
   0x1   :  { %v4_v0 = vld [vmem:[%s28_s0] ss:$0 sm:$0xff] }
   0x2   :  { %5 = vst [vmem:[%s29_s1] sm:$0xff] %v4_v0  ;;  %8 = vst [vmem:[%s29_s1 + $0x8] sm:$0xff] %v4_v0 }

// kernel: tile.14
= control target key start
LH: loop header
LB: loop body
LE: loop exit
PB: predicated region body
PF: predicated region fallthrough
CT: control target
= control target key end

     0   :  { %s123_s10 = smov 56   ;;  %s124_s11 = smov 48   ;;  %vm3_vm0 = vcmask 31744   ;;  %vm9_vm1 = vcmask 490944   ;;  %vm15_vm2 = vcmask 458144   ;;  %vm21_vm3 = vcmask 425344   ;;  %s195_s0 = inlined_call_operand.vmem [shape: f32[15,4], index: 0, kind: input, shape index: {}]   ;;  %s196_s1 = inlined_call_operand.vmem [shape: f32[1,1,60], index: 1, kind: output, shape index: {}]  }
   0x1   :  { %v95_v0 = vld [vmem:[%s195_s0 + $0xe] sm:$0x1]   ;;  %v97_v1 = vld [vmem:[%s195_s0 + $0xc] sm:$0x1]   ;;  %v96_v2 = vld [vmem:[%s195_s0 + $0xd] sm:$0x1]  }
   0x2   :  { %7 = vrot.lane.b32.xlu0 %v95_v0, %s123_s10  ;;  %19 = vrot.lane.b32.xlu1 %v97_v1, %s124_s11  ;;  %v98_v3 = vld [vmem:[%s195_s0 + $0xb] sm:$0x1]   ;;  %s125_s16 = smov 52   ;;  %s126_s17 = smov 44   ;;  %v99_v4 = vld [vmem:[%s195_s0 + $0xa] sm:$0x1]  }
   0x3   :  { %v100_v5 = vld [vmem:[%s195_s0 + $0x9] sm:$0x1]   ;;  %v2_v6 = vld [vmem:[%s195_s0] sm:$0x1]   ;;  %s127_s24 = smov 40   ;;  %s128_s25 = smov 36  }
   0x4   :  { %4 = vst.msk [vmem:[#allocation0] sm:$0x1] %vm3_vm0, %v2_v6   ;;  %v101_v7 = vld [vmem:[%s195_s0 + $0x8] sm:$0x1]   ;;  %v102_v8 = vld [vmem:[%s195_s0 + $0x7] sm:$0x1]  }
   0x5   :  { %s129_s30 = smov 32   ;;  %s130_s2 = smov 28   ;;  %v103_v9 = vld [vmem:[%s195_s0 + $0x6] sm:$0x1]   ;;  %v104_v10 = vld [vmem:[%s195_s0 + $0x5] sm:$0x1]  }
   0x6   :  { %13 = vrot.lane.b32.xlu0 %v96_v2, %s125_s16  ;;  %25 = vrot.lane.b32.xlu1 %v98_v3, %s126_s17  ;;  %s131_s7 = smov 24   ;;  %s132_s8 = smov 20   ;;  %v105_v11 = vld [vmem:[%s195_s0 + $0x4] sm:$0x1]   ;;  %v106_v12 = vld [vmem:[%s195_s0 + $0x3] sm:$0x1]  }
   0x7   :  { %s133_s13 = smov 16   ;;  %s134_s14 = smov 12   ;;  %v107_v13 = vld [vmem:[%s195_s0 + $0x2] sm:$0x1]   ;;  %v108_v14 = vld [vmem:[%s195_s0 + $0x1] sm:$0x1]  }
   0x8   :  { %s135_s0 = smov 8   ;;  %s136_s19 = smov 4   ;;  %vm27_vm4 = vcmask 392544   ;;  %vm33_vm5 = vcmask 359744   ;;  %vm39_vm6 = vcmask 326944   ;;  %vm45_vm7 = vcmask 294144  }
   0x9   :  { %vm51_vm8 = vcmask 261344   ;;  %vm57_vm9 = vcmask 228544   ;;  %vm63_vm10 = vcmask 195744   ;;  %vm69_vm11 = vcmask 162944  }
   0xa   :  { %31 = vrot.lane.b32.xlu0 %v99_v4, %s127_s24  ;;  %37 = vrot.lane.b32.xlu1 %v100_v5, %s128_s25  ;;  %vm75_vm12 = vcmask 130144   ;;  %vm81_vm13 = vcmask 97344   ;;  %vm87_vm14 = vcmask 64544  }
   0xe   :  { %43 = vrot.lane.b32.xlu0 %v101_v7, %s129_s30  ;;  %49 = vrot.lane.b32.xlu1 %v102_v8, %s130_s2 }
  0x12   :  { %55 = vrot.lane.b32.xlu0 %v103_v9, %s131_s7  ;;  %61 = vrot.lane.b32.xlu1 %v104_v10, %s132_s8 }
  0x16   :  { %67 = vrot.lane.b32.xlu0 %v105_v11, %s133_s13  ;;  %73 = vrot.lane.b32.xlu1 %v106_v12, %s134_s14 }
  0x1a   :  { %79 = vrot.lane.b32.xlu0 %v107_v13, %s135_s0  ;;  %85 = vrot.lane.b32.xlu1 %v108_v14, %s136_s19 }
  0x74   :  { %v8_v15 = vpop.permute.xlu0 %7   ;;  %v20_v16 = vpop.permute.xlu1 %19  }
  0x75   :  { %10 = vst.msk [vmem:[#allocation0] sm:$0x1] %vm9_vm1, %v8_v15  }
  0x78   :  { %v14_v17 = vpop.permute.xlu0 %13   ;;  %v26_v18 = vpop.permute.xlu1 %25  }
  0x79   :  { %16 = vst.msk [vmem:[#allocation0] sm:$0x1] %vm15_vm2, %v14_v17  }
  0x7a   :  { %22 = vst.msk [vmem:[#allocation0] sm:$0x1] %vm21_vm3, %v20_v16  }
  0x7b   :  { %28 = vst.msk [vmem:[#allocation0] sm:$0x1] %vm27_vm4, %v26_v18  }
  0x7c   :  { %v32_v19 = vpop.permute.xlu0 %31   ;;  %v38_v20 = vpop.permute.xlu1 %37  }
  0x7d   :  { %34 = vst.msk [vmem:[#allocation0] sm:$0x1] %vm33_vm5, %v32_v19  }
  0x7e   :  { %40 = vst.msk [vmem:[#allocation0] sm:$0x1] %vm39_vm6, %v38_v20  }
  0x80   :  { %v44_v21 = vpop.permute.xlu0 %43   ;;  %v50_v22 = vpop.permute.xlu1 %49  }
  0x81   :  { %46 = vst.msk [vmem:[#allocation0] sm:$0x1] %vm45_vm7, %v44_v21  }
  0x82   :  { %52 = vst.msk [vmem:[#allocation0] sm:$0x1] %vm51_vm8, %v50_v22  }
  0x84   :  { %v56_v23 = vpop.permute.xlu0 %55   ;;  %v62_v24 = vpop.permute.xlu1 %61  }
  0x85   :  { %58 = vst.msk [vmem:[#allocation0] sm:$0x1] %vm57_vm9, %v56_v23  }
  0x86   :  { %64 = vst.msk [vmem:[#allocation0] sm:$0x1] %vm63_vm10, %v62_v24  }
  0x88   :  { %v68_v25 = vpop.permute.xlu0 %67   ;;  %v74_v26 = vpop.permute.xlu1 %73  }
  0x89   :  { %70 = vst.msk [vmem:[#allocation0] sm:$0x1] %vm69_vm11, %v68_v25  }
  0x8a   :  { %76 = vst.msk [vmem:[#allocation0] sm:$0x1] %vm75_vm12, %v74_v26  }
  0x8c   :  { %v80_v27 = vpop.permute.xlu0 %79   ;;  %v86_v28 = vpop.permute.xlu1 %85  }
  0x8d   :  { %82 = vst.msk [vmem:[#allocation0] sm:$0x1] %vm81_vm13, %v80_v27  }
  0x8e   :  { %88 = vst.msk [vmem:[#allocation0] sm:$0x1] %vm87_vm14, %v86_v28  }
  0x95   :  { %v92_v29 = vld [vmem:[#allocation0] sm:$0x1] }
  0x96   :  { %94 = vst [vmem:[%s196_s1] sm:$0x1] %v92_v29 }

// kernel: tile.18
= control target key start
LH: loop header
LB: loop body
LE: loop exit
PB: predicated region body
PF: predicated region fallthrough
CT: control target
= control target key end

     0   :  { %s28_s0 = inlined_call_operand.vmem [shape: f32[8], index: 0, kind: input, shape index: {}]   ;;  %s29_s1 = inlined_call_operand.vmem [shape: f32[14,8], index: 1, kind: output, shape index: {}]  }
   0x1   :  { %v4_v0 = vld [vmem:[%s28_s0] ss:$0 sm:$0xff] }
   0x2   :  { %5 = vst [vmem:[%s29_s1] sm:$0xff] %v4_v0  ;;  %8 = vst [vmem:[%s29_s1 + $0x8] sm:$0xff] %v4_v0 }

// kernel: tile.19
= control target key start
LH: loop header
LB: loop body
LE: loop exit
PB: predicated region body
PF: predicated region fallthrough
CT: control target
= control target key end

     0   :  { %s115_s10 = smov 104   ;;  %s116_s11 = smov 88   ;;  %vm3_vm0 = vcmask 64512   ;;  %vm9_vm1 = vcmask 917312   ;;  %vm15_vm2 = vcmask 851712   ;;  %vm21_vm3 = vcmask 786112   ;;  %s183_s0 = inlined_call_operand.vmem [shape: f32[14,8], index: 0, kind: input, shape index: {}]   ;;  %s184_s1 = inlined_call_operand.vmem [shape: f32[1,1,112], index: 1, kind: output, shape index: {}]  }
   0x1   :  { %v89_v0 = vld [vmem:[%s183_s0 + $0xd] sm:$0x1]   ;;  %v91_v1 = vld [vmem:[%s183_s0 + $0xb] sm:$0x1]   ;;  %v90_v2 = vld [vmem:[%s183_s0 + $0xc] sm:$0x1]  }
   0x2   :  { %7 = vrot.lane.b32.xlu0 %v89_v0, %s115_s10  ;;  %19 = vrot.lane.b32.xlu1 %v91_v1, %s116_s11  ;;  %v92_v3 = vld [vmem:[%s183_s0 + $0xa] sm:$0x1]   ;;  %s117_s16 = smov 96   ;;  %s118_s17 = smov 80   ;;  %v93_v4 = vld [vmem:[%s183_s0 + $0x9] sm:$0x1]  }
   0x3   :  { %v94_v5 = vld [vmem:[%s183_s0 + $0x8] sm:$0x1]   ;;  %v2_v6 = vld [vmem:[%s183_s0] sm:$0x1]   ;;  %s119_s24 = smov 72   ;;  %s120_s25 = smov 64  }
   0x4   :  { %4 = vst.msk [vmem:[#allocation0] sm:$0x1] %vm3_vm0, %v2_v6   ;;  %v95_v7 = vld [vmem:[%s183_s0 + $0x7] sm:$0x1]   ;;  %v96_v8 = vld [vmem:[%s183_s0 + $0x6] sm:$0x1]  }
   0x5   :  { %s121_s30 = smov 56   ;;  %s122_s2 = smov 48   ;;  %v97_v9 = vld [vmem:[%s183_s0 + $0x5] sm:$0x1]   ;;  %v98_v10 = vld [vmem:[%s183_s0 + $0x4] sm:$0x1]  }
   0x6   :  { %13 = vrot.lane.b32.xlu0 %v90_v2, %s117_s16  ;;  %25 = vrot.lane.b32.xlu1 %v92_v3, %s118_s17  ;;  %s123_s7 = smov 40   ;;  %s124_s8 = smov 32   ;;  %v99_v11 = vld [vmem:[%s183_s0 + $0x3] sm:$0x1]   ;;  %v100_v12 = vld [vmem:[%s183_s0 + $0x2] sm:$0x1]  }
   0x7   :  { %s125_s13 = smov 24   ;;  %s126_s14 = smov 16   ;;  %v101_v13 = vld [vmem:[%s183_s0 + $0x1] sm:$0x1]   ;;  %vm27_vm4 = vcmask 720512   ;;  %vm33_vm5 = vcmask 654912  }
   0x8   :  { %s127_s0 = smov 8   ;;  %vm39_vm6 = vcmask 589312   ;;  %vm45_vm7 = vcmask 523712   ;;  %vm51_vm8 = vcmask 458112   ;;  %vm57_vm9 = vcmask 392512  }
   0x9   :  { %vm63_vm10 = vcmask 326912   ;;  %vm69_vm11 = vcmask 261312   ;;  %vm75_vm12 = vcmask 195712   ;;  %vm81_vm13 = vcmask 130112  }
   0xa   :  { %31 = vrot.lane.b32.xlu0 %v93_v4, %s119_s24  ;;  %37 = vrot.lane.b32.xlu1 %v94_v5, %s120_s25 }
   0xe   :  { %43 = vrot.lane.b32.xlu0 %v95_v7, %s121_s30  ;;  %49 = vrot.lane.b32.xlu1 %v96_v8, %s122_s2 }
  0x12   :  { %55 = vrot.lane.b32.xlu0 %v97_v9, %s123_s7  ;;  %61 = vrot.lane.b32.xlu1 %v98_v10, %s124_s8 }
  0x16   :  { %67 = vrot.lane.b32.xlu0 %v99_v11, %s125_s13  ;;  %73 = vrot.lane.b32.xlu1 %v100_v12, %s126_s14 }
  0x1a   :  { %79 = vrot.lane.b32.xlu0 %v101_v13, %s127_s0 }
  0x74   :  { %v8_v14 = vpop.permute.xlu0 %7   ;;  %v20_v15 = vpop.permute.xlu1 %19  }
  0x75   :  { %10 = vst.msk [vmem:[#allocation0] sm:$0x1] %vm9_vm1, %v8_v14  }
  0x78   :  { %v14_v16 = vpop.permute.xlu0 %13   ;;  %v26_v17 = vpop.permute.xlu1 %25  }
  0x79   :  { %16 = vst.msk [vmem:[#allocation0] sm:$0x1] %vm15_vm2, %v14_v16  }
  0x7a   :  { %22 = vst.msk [vmem:[#allocation0] sm:$0x1] %vm21_vm3, %v20_v15  }
  0x7b   :  { %28 = vst.msk [vmem:[#allocation0] sm:$0x1] %vm27_vm4, %v26_v17  }
  0x7c   :  { %v32_v18 = vpop.permute.xlu0 %31   ;;  %v38_v19 = vpop.permute.xlu1 %37  }
  0x7d   :  { %34 = vst.msk [vmem:[#allocation0] sm:$0x1] %vm33_vm5, %v32_v18  }
  0x7e   :  { %40 = vst.msk [vmem:[#allocation0] sm:$0x1] %vm39_vm6, %v38_v19  }
  0x80   :  { %v44_v20 = vpop.permute.xlu0 %43   ;;  %v50_v21 = vpop.permute.xlu1 %49  }
  0x81   :  { %46 = vst.msk [vmem:[#allocation0] sm:$0x1] %vm45_vm7, %v44_v20  }
  0x82   :  { %52 = vst.msk [vmem:[#allocation0] sm:$0x1] %vm51_vm8, %v50_v21  }
  0x84   :  { %v56_v22 = vpop.permute.xlu0 %55   ;;  %v62_v23 = vpop.permute.xlu1 %61  }
  0x85   :  { %58 = vst.msk [vmem:[#allocation0] sm:$0x1] %vm57_vm9, %v56_v22  }
  0x86   :  { %64 = vst.msk [vmem:[#allocation0] sm:$0x1] %vm63_vm10, %v62_v23  }
  0x88   :  { %v68_v24 = vpop.permute.xlu0 %67   ;;  %v74_v25 = vpop.permute.xlu1 %73  }
  0x89   :  { %70 = vst.msk [vmem:[#allocation0] sm:$0x1] %vm69_vm11, %v68_v24  }
  0x8a   :  { %76 = vst.msk [vmem:[#allocation0] sm:$0x1] %vm75_vm12, %v74_v25  }
  0x8c   :  { %v80_v26 = vpop.permute.xlu0 %79  }
  0x8d   :  { %82 = vst.msk [vmem:[#allocation0] sm:$0x1] %vm81_vm13, %v80_v26  }
  0x94   :  { %v86_v27 = vld [vmem:[#allocation0] sm:$0x1] }
  0x95   :  { %88 = vst [vmem:[%s184_s1] sm:$0x1] %v86_v27 }

// kernel: last_conv_forward.1
= control target key start
LH: loop header
LB: loop body
LE: loop exit
PB: predicated region body
PF: predicated region fallthrough
CT: control target
= control target key end

     0   :  { %s1004_s24 = smov 0   ;;  %s1137_s0 = inlined_call_operand.vmem [shape: f32[2,16,64], index: 0, kind: input, shape index: {}]   ;;  %s1138_s1 = inlined_call_operand.vmem [shape: f32[64,60], index: 1, kind: input, shape index: {}]   ;;  %s1139_s2 = inlined_call_operand.vmem [shape: f32[64,60], index: 2, kind: input, shape index: {}]   ;;  %s1140_s3 = inlined_call_operand.vmem [shape: f32[1,1,60], index: 3, kind: input, shape index: {}]   ;;  %s1141_s4 = inlined_call_operand.vmem [shape: f32[60,112], index: 4, kind: input, shape index: {}]   ;;  %s1142_s5 = inlined_call_operand.vmem [shape: f32[60,112], index: 5, kind: input, shape index: {}]   ;;  %s1143_s6 = inlined_call_operand.vmem [shape: f32[1,1,112], index: 6, kind: input, shape index: {}]   ;;  %s1144_s7 = inlined_call_operand.vmem [shape: f32[2,14,112], index: 7, kind: output, shape index: {}]  }
   0x1 LB: > { %s737_s25 = sadd.s32 4294967295, %s961_s24   ;;  %p741_p0 = scmp.ge.s32.totalorder %s961_s24, 1  ;;  %s961_s24 = sphi %s1004_s24, %s17_s24  }
   0x2   : > { %p237_p1 = scmp.lt.s32.totalorder %s961_s24, 3 }
   0x4   : > { %p238_p2 = pnand %p741_p0, %p237_p1 }
   0x5   : > { %v371_v0 = vld [vmem:[%s1139_s2] sm:$0xff] (!%p238_p2)  ;;  %v372_v1 = vld [vmem:[%s1139_s2 + $0x8] sm:$0xff] (!%p238_p2)  ;;  %p269_p3 = scmp.lt.s32.totalorder (!%p238_p2), %s737_s25, 1  ;;  %v373_v5 = vld [vmem:[%s1139_s2 + $0x10] sm:$0xff] (!%p238_p2)  ;;  %vm289_vm0 = vcmask (!%p238_p2), 523264   ;;  %vm495_vm1 = vcmask (!%p238_p2), 1043456  }
   0x6   : > { %241 = sbr.rel (%p238_p2) target bundleno = 470 (0x1d6), region = 48  ;;  %v281_v2 = vld [vmem:[%s1138_s1] sm:$0xff] (!%p238_p2)  ;;  %v894_v3 = vpack.c.bf16 (!%p238_p2), %v372_v1, %v371_v0  ;;  %v282_v4 = vld [vmem:[%s1138_s1 + $0x8] sm:$0xff] (!%p238_p2)  ;;  %v374_v6 = vld [vmem:[%s1139_s2 + $0x18] sm:$0xff] (!%p238_p2)  ;;  %vm963_vm2 = vmmov (!%p238_p2), 1   ;;  %vm456_vm4 = vcmask (!%p238_p2), 1046528  }
   0x7   : > { %v878_v7 = vpack.c.bf16 (!%p238_p2), %v282_v4, %v281_v2  ;;  %v898_v8 = vpack.c.bf16 (!%p238_p2), %v374_v6, %v373_v5  ;;  %v283_v9 = vld [vmem:[%s1138_s1 + $0x10] sm:$0xff] (!%p238_p2)  ;;  %v284_v10 = vld [vmem:[%s1138_s1 + $0x18] sm:$0xff] (!%p238_p2)  ;;  %v375_v11 = vld [vmem:[%s1139_s2 + $0x20] sm:$0xff] (!%p238_p2)  ;;  %vm488_vm7 = vcmask (!%p238_p2), 490496   ;;  %vm680_vm8 = vcmask (!%p238_p2), 914432  }
   0x8   : > { %895 = vmatprep.subr.bf16.mxu1 (!%p238_p2), %v894_v3  ;;  %v882_v12 = vpack.c.bf16 (!%p238_p2), %v284_v10, %v283_v9  ;;  %v376_v13 = vld [vmem:[%s1139_s2 + $0x28] sm:$0xff] (!%p238_p2)  ;;  %v285_v14 = vld [vmem:[%s1138_s1 + $0x20] sm:$0xff] (!%p238_p2)  ;;  %v377_v18 = vld [vmem:[%s1139_s2 + $0x30] sm:$0xff] (!%p238_p2)  ;;  %vm678_vm9 = vcmask (!%p238_p2), 916480  }
   0x9   : > { %v286_v15 = vld [vmem:[%s1138_s1 + $0x28] sm:$0xff] (!%p238_p2)  ;;  %897 = vmatpush3.bf16.msra.mxu1 (!%p238_p2), %v894_v3  ;;  %879 = vmatprep.subr.bf16.mxu0 (!%p238_p2), %v878_v7  ;;  %v902_v16 = vpack.c.bf16 (!%p238_p2), %v376_v13, %v375_v11  ;;  %v378_v19 = vld [vmem:[%s1139_s2 + $0x38] sm:$0xff] (!%p238_p2)  ;;  %v287_v21 = vld [vmem:[%s1138_s1 + $0x30] sm:$0xff] (!%p238_p2) }
   0xa   : > { %881 = vmatpush3.bf16.msra.mxu0 (!%p238_p2), %v878_v7  ;;  %899 = vmatprep.subr.bf16.mxu1 (!%p238_p2), %v898_v8  ;;  %v886_v17 = vpack.c.bf16 (!%p238_p2), %v286_v15, %v285_v14  ;;  %v288_v22 = vld [vmem:[%s1138_s1 + $0x38] sm:$0xff] (!%p238_p2)  ;;  %v906_v23 = vpack.c.bf16 (!%p238_p2), %v378_v19, %v377_v18  ;;  %v574_v25 = vld [vmem:[%s1142_s5] sm:$0xff] (!%p238_p2)  ;;  %v575_v26 = vld [vmem:[%s1142_s5 + $0x8] sm:$0xff] (!%p238_p2) }
   0xb   : > { %883 = vmatprep.subr.bf16.mxu0 (!%p238_p2), %v882_v12  ;;  %v890_v24 = vpack.c.bf16 (!%p238_p2), %v288_v22, %v287_v21  ;;  %v480_v27 = vld [vmem:[%s1141_s4] sm:$0xff] (!%p238_p2)  ;;  %v481_v28 = vld [vmem:[%s1141_s4 + $0x8] sm:$0xff] (!%p238_p2)  ;;  %v928_v29 = vpack.c.bf16 (!%p238_p2), %v575_v26, %v574_v25  ;;  %v482_v32 = vld [vmem:[%s1141_s4 + $0x10] sm:$0xff] (!%p238_p2) }
   0xc   : > { %v910_v30 = vpack.c.bf16 (!%p238_p2), %v481_v28, %v480_v27  ;;  %v483_v33 = vld [vmem:[%s1141_s4 + $0x18] sm:$0xff] (!%p238_p2)  ;;  %v576_v34 = vld [vmem:[%s1142_s5 + $0x10] sm:$0xff] (!%p238_p2)  ;;  %v484_v38 = vld [vmem:[%s1141_s4 + $0x20] sm:$0xff] (!%p238_p2) }
   0xd   : > { %s1146_s25 = smov (!%p269_p3, %s737_s25), 1  ;;  %901 = vmatpush3.bf16.msra.mxu1 %v898_v8  ;;  %v914_v35 = vpack.c.bf16 %v483_v33, %v482_v32  ;;  %v577_v36 = vld [vmem:[%s1142_s5 + $0x18] sm:$0xff]  ;;  %v485_v39 = vld [vmem:[%s1141_s4 + $0x28] sm:$0xff]  ;;  %v578_v40 = vld [vmem:[%s1142_s5 + $0x20] sm:$0xff] }
   0xe   : > { %s760_s29 = sshll.u32 %s1146_s25, 4  ;;  %885 = vmatpush3.bf16.msra.mxu0 %v882_v12  ;;  %903 = vmatprep.subr.bf16.mxu1 %v902_v16  ;;  %v932_v37 = vpack.c.bf16 %v577_v36, %v576_v34  ;;  %v918_v41 = vpack.c.bf16 %v485_v39, %v484_v38  ;;  %v579_v42 = vld [vmem:[%s1142_s5 + $0x28] sm:$0xff]  ;;  %v486_v44 = vld [vmem:[%s1141_s4 + $0x30] sm:$0xff]  ;;  %v487_v45 = vld [vmem:[%s1141_s4 + $0x38] sm:$0xf] }
   0xf   : > { %s273_s9 = scalar_lea.vmem %s1137_s0, %s760_s29  ;;  %887 = vmatprep.subr.bf16.mxu0 %v886_v17  ;;  %v936_v43 = vpack.c.bf16 %v579_v42, %v578_v40  ;;  %v580_v46 = vld [vmem:[%s1142_s5 + $0x30] sm:$0xff]  ;;  %v922_v47 = vpack.c.bf16 %v487_v45, %v486_v44  ;;  %v581_v48 = vld [vmem:[%s1142_s5 + $0x38] sm:$0xf]  ;;  %vm923_vm3 = vmpackc.low %vm495_vm1, %vm963_vm2  ;;  %s278_s16 = scalar_lea.vmem %s1144_s7, %s760_s29 }
  0x10   : > { %v279_v20 = vld [vmem:[%s273_s9] sm:$0xff]  ;;  %v280_v31 = vld [vmem:[%s273_s9 + $0x8] sm:$0xff]  ;;  %v940_v49 = vpack.c.bf16 %v581_v48, %v580_v46 }
  0x11   : > { %837 = vmatprep.mubr.msk.f32.mxu1 %vm289_vm0, %v279_v20  ;;  %818 = vmatprep.mubr.msk.f32.mxu0 %vm289_vm0, %v279_v20  ;;  %v750_v55 = vld [vmem:[%s1140_s3] ss:$0 sm:$0xff] }
  0x12   : > { %905 = vmatpush3.bf16.msra.mxu1 %v902_v16  ;;  %889 = vmatpush3.bf16.msra.mxu0 %v886_v17  ;;  %v757_v8 = vld [vmem:[%s1143_s6] ss:$0 sm:$0xff] }
  0x13   : > { %907 = vmatprep.subr.bf16.mxu1 %v906_v23  ;;  %891 = vmatprep.subr.bf16.mxu0 %v890_v24 }
  0x16   : > { %909 = vmatpush3.bf16.msra.mxu1 %v906_v23  ;;  %893 = vmatpush3.bf16.msra.mxu0 %v890_v24 }
  0x17   : > { %929 = vmatprep.subr.bf16.mxu1 %v928_v29  ;;  %911 = vmatprep.subr.bf16.mxu0 %v910_v30 }
  0x19   : > { %838 = vmatmul.mubr.msk.f32.vlgmr.msra.gmra.mrb[0].mxu1 %vm289_vm0, %v280_v31  ;;  %819 = vmatmul.mubr.msk.f32.vlgmr.msra.gmra.mrb[0].mxu0 %vm289_vm0, %v280_v31 }
  0x1a   : > { %931 = vmatpush3.bf16.msra.mxu1 %v928_v29  ;;  %913 = vmatpush3.bf16.msra.mxu0 %v910_v30 }
  0x1b   : > { %915 = vmatprep.subr.bf16.mxu0 %v914_v35  ;;  %933 = vmatprep.subr.bf16.mxu1 %v932_v37 }
  0x1e   : > { %917 = vmatpush3.bf16.msra.mxu0 %v914_v35  ;;  %935 = vmatpush3.bf16.msra.mxu1 %v932_v37 }
  0x1f   : > { %919 = vmatprep.subr.bf16.mxu0 %v918_v41  ;;  %937 = vmatprep.subr.bf16.mxu1 %v936_v43 }
  0x22   : > { %921 = vmatpush3.bf16.msra.mxu0 %v918_v41  ;;  %939 = vmatpush3.bf16.msra.mxu1 %v936_v43 }
  0x23   : > { %924 = vmatprep.subr.msk.bf16.mxu0 %vm923_vm3, %v922_v47  ;;  %942 = vmatprep.subr.msk.bf16.mxu1 %vm923_vm3, %v940_v49 }
  0x26   : > { %927 = vmatpush3.bf16.msk.msra.mxu0 %vm923_vm3, %v922_v47  ;;  %945 = vmatpush3.bf16.msk.msra.mxu1 %vm923_vm3, %v940_v49 }
  0xec   : > { %v839_v50 = vpop.f32.mrb[0].mxu1  ;;  %v820_v53 = vpop.f32.mrb[0].mxu0 }
  0xed   : > { %v458_v51 = vrot.slane %v839_v50, 1  ;;  %v445_v52 = vpop.f32.mrb[1].mxu1  ;;  %v362_v56 = vpop.f32.mrb[1].mxu0 }
  0xee   : > { %v457_v54 = vrot.slane %v445_v52, 1 }
  0xef   : > { %v463_v57 = vadd.f32 %v820_v53, %v458_v51 }
  0xf0   : > { %v459_v58 = vsel %vm456_vm4, %v457_v54, %v458_v51 }
  0xf1   : > { %v472_v59 = vadd.f32 %v750_v55, %v463_v57  ;;  %v462_v60 = vadd.f32 %v459_v58, %v362_v56 }
  0xf3   : > { %vm474_vm5 = vcmp.ge.f32.partialorder %v472_v59, 0.0  ;;  %v476_v61 = vmul.f32 0.01, %v472_v59  ;;  %v471_v62 = vadd.f32 %v750_v55, %v462_v60 }
  0xf5   : > { %v475_v63 = vmul.f32 0.01, %v471_v62  ;;  %vm473_vm6 = vcmp.ge.f32.partialorder %v471_v62, 0.0  ;;  %v478_v0 = vsel %vm474_vm5, %v472_v59, %v476_v61 }
  0xf6   : > { %v479_v2 = vsel %vm456_vm4, %v478_v0, 0.0 }
  0xf7   : > { %v477_v1 = vsel %vm473_vm6, %v471_v62, %v475_v63 }
  0xf8   : > { %856 = vmatprep.mubr.msk.f32.mxu0 %vm488_vm7, %v477_v1  ;;  %875 = vmatprep.mubr.msk.f32.mxu1 %vm488_vm7, %v477_v1 }
  0xf9   : > { %857 = vmatmul.mubr.msk.f32.vlgmr.msra.gmra.mrb[2].mxu0 %vm488_vm7, %v479_v2  ;;  %876 = vmatmul.mubr.msk.f32.vlgmr.msra.gmra.mrb[2].mxu1 %vm488_vm7, %v479_v2 }
 0x1cc   : > { %v858_v3 = vpop.f32.mrb[2].mxu0  ;;  %v877_v4 = vpop.f32.mrb[2].mxu1 }
 0x1cd   : > { %v663_v5 = vrot.slane %v877_v4, 1  ;;  %v565_v6 = vpop.f32.mrb[3].mxu0  ;;  %v651_v7 = vpop.f32.mrb[3].mxu1 }
 0x1ce   : > { %v662_v9 = vrot.slane %v651_v7, 1 }
 0x1cf   : > { %v668_v10 = vadd.f32 %v858_v3, %v663_v5 }
 0x1d0   : > { %v664_v11 = vsel %vm456_vm4, %v662_v9, %v663_v5 }
 0x1d1   : > { %v677_v12 = vadd.f32 %v757_v8, %v668_v10  ;;  %v667_v13 = vadd.f32 %v664_v11, %v565_v6 }
 0x1d3   : > { %681 = vst.msk [vmem:[%s278_s16 + $0x8] sm:$0x3f] %vm680_vm8, %v677_v12  ;;  %v676_v14 = vadd.f32 %v757_v8, %v667_v13 }
 0x1d5   : > { %679 = vst.msk [vmem:[%s278_s16] sm:$0xff] %vm678_vm9, %v676_v14 }
 0x1d6 PF: > { %s17_s24 = sadd.s32 1, %s961_s24  }
 0x1d7   : > { %p14_p4 = scmp.ge.s32.totalorder %s17_s24, 4  }
 0x1d9   :  { %16 = sbr.rel (!%p14_p4) target bundleno = 1 (0x1), region = 78 }

</bundles_post_ra>
